<compile_context>
chip_gen: v5e
topology: v5e:2x2
jax: 0.10.0
libtpu: 0.0.40
codegen_flags: <defaults>
</compile_context>

<pallas_src>
import math

import jax
import jax.numpy as jnp
from jax.experimental import pallas as pl
from jax.experimental.pallas import tpu as pltpu

OBSERVATION_SPACE_SIZE = 20
STATE_SIZE = OBSERVATION_SPACE_SIZE * OBSERVATION_SPACE_SIZE * 5  # 2000
ACTION_SIZE = 6
HIDDEN = 64

H_PAD = 128       # hidden width padded to full lane width -> lane-dense h1/h2
OUT_PAD = 128     # lane-dense f32 output slab; sliced to ACTION_SIZE outside
TB_MAX = 1024     # max batch tile: 2 bufs x 1024 x 2000 x 2B ~= 7.6 MiB of input VMEM


def qnetwork_kernel(x_ref, w1_ref, b1_ref, w2_ref, b2_ref, w3_ref, b3_ref, o_ref):
    # fc1 + ReLU: bf16 MXU inputs, f32 accumulation, f32 bias-add / ReLU.
    h1 = jnp.dot(x_ref[...], w1_ref[...],
                 preferred_element_type=jnp.float32) + b1_ref[...]
    h1 = jnp.maximum(h1, 0.0)

    # fc2 + ReLU (VMEM-resident 128-lane intermediate, never touches HBM).
    h2 = jnp.dot(h1.astype(jnp.bfloat16), w2_ref[...],
                 preferred_element_type=jnp.float32) + b2_ref[...]
    h2 = jnp.maximum(h2, 0.0)

    # fc3 (no activation).
    q = jnp.dot(h2.astype(jnp.bfloat16), w3_ref[...],
                preferred_element_type=jnp.float32) + b3_ref[...]
    o_ref[...] = q.astype(o_ref.dtype)


def _round_up(x, m):
    return ((x + m - 1) // m) * m


def _pad2(a, rows, cols):
    return jnp.pad(a, ((0, rows - a.shape[0]), (0, cols - a.shape[1])))


@jax.jit
def qnetwork_forward(state, params):
    """state: (B, STATE_SIZE), any float/int dtype (cast to bf16 -- exact for
    the 0..3 observation values). params: pre-padded tuple from init_params.
    Returns Q-values (B, ACTION_SIZE) float32."""
    w1, b1, w2, b2, w3, b3 = params
    B, K = state.shape
    assert K == STATE_SIZE

    x = state.astype(jnp.bfloat16)  # no-op when the caller already passes bf16

    # Batch tile: multiple of 16 (bf16 sublane pack), aiming for >=2 grid
    # steps so the "parallel" axis shards across v7x's two TensorCores.
    # Tiny batches fall back to one full-extent block (legal: equals the dim).
    tb = min(TB_MAX, max(16, _round_up(pl.cdiv(B, 2), 16)))
    if tb > B:
        tb = B
    num_tiles = pl.cdiv(B, tb)

    # Weights/biases: constant index_map -> fetched once, VMEM-resident
    # across all batch tiles.
    const = lambda shape: pl.BlockSpec(shape, lambda i: (0,) * len(shape))

    q_pad = pl.pallas_call(
        qnetwork_kernel,
        out_shape=jax.ShapeDtypeStruct((B, OUT_PAD), jnp.float32),
        grid=(num_tiles,),
        in_specs=[
            pl.BlockSpec((tb, STATE_SIZE), lambda i: (i, 0)),   # batch-tiled input
            const((STATE_SIZE, H_PAD)), const((1, H_PAD)),      # fc1
            const((H_PAD, H_PAD)), const((1, H_PAD)),           # fc2
            const((H_PAD, OUT_PAD)), const((1, OUT_PAD)),       # fc3
        ],
        out_specs=pl.BlockSpec((tb, OUT_PAD), lambda i: (i, 0)),
        compiler_params=pltpu.CompilerParams(
            dimension_semantics=("parallel",),   # megacore shard on v7x
            vmem_limit_bytes=32 << 20,           # ~10 MiB used at tb=1024
        ),
    )(x, w1, b1, w2, b2, w3, b3)

    return q_pad[:, :ACTION_SIZE]


def init_params(key):
    """PyTorch nn.Linear-style init (uniform +-1/sqrt(fan_in)).

    Params are stored already padded to the kernel geometry and pre-cast
    (done ONCE here, not per forward call):
      * weights: (in, out) zero-padded to lane-dense widths, bf16
      * biases:  (1, out) zero-padded, f32
    Zero padding is numerically exact (padded rows/columns contribute 0).
    """
    def linear(key, fan_in, fan_out, in_pad, out_pad):
        kw, kb = jax.random.split(key)
        bound = 1.0 / math.sqrt(fan_in)
        w = jax.random.uniform(kw, (fan_in, fan_out), jnp.float32, -bound, bound)
        b = jax.random.uniform(kb, (1, fan_out), jnp.float32, -bound, bound)
        return _pad2(w, in_pad, out_pad).astype(jnp.bfloat16), _pad2(b, 1, out_pad)

    k1, k2, k3 = jax.random.split(key, 3)
    w1, b1 = linear(k1, STATE_SIZE, HIDDEN, STATE_SIZE, H_PAD)
    w2, b2 = linear(k2, HIDDEN, HIDDEN, H_PAD, H_PAD)
    w3, b3 = linear(k3, HIDDEN, ACTION_SIZE, H_PAD, OUT_PAD)
    return (w1, b1, w2, b2, w3, b3)


def reference_forward(state, params):
    """Pure-JAX reference with identical numerics (bf16 MXU inputs, f32 acc)."""
    w1, b1, w2, b2, w3, b3 = params
    bf, f32 = jnp.bfloat16, jnp.float32
    x = state.astype(bf)
    h1 = jnp.maximum(jnp.dot(x, w1, preferred_element_type=f32) + b1, 0.0)
    h2 = jnp.maximum(jnp.dot(h1.astype(bf), w2, preferred_element_type=f32) + b2, 0.0)
    q = jnp.dot(h2.astype(bf), w3, preferred_element_type=f32) + b3
    return q[:, :ACTION_SIZE]


if __name__ == "__main__":
    key = jax.random.PRNGKey(0)
    k_params, k_state = jax.random.split(key)

    params = init_params(k_params)

    # Batch of 2 flattened observations. The obs space is uint8 in [0, 3];
    # bf16 represents those values exactly, so the input stream is half the
    # bytes of f32 with no numerical change.
    batch = 2
    obs = jax.random.randint(k_state, (batch, STATE_SIZE), 0, 4, dtype=jnp.int32)
    state = obs.astype(jnp.bfloat16)

    q = qnetwork_forward(state, params)
    q = jax.block_until_ready(q)

    q_ref = reference_forward(state, params)
    assert q.shape == (batch, ACTION_SIZE)
    assert jnp.allclose(q, q_ref, atol=1e-2, rtol=1e-2), "mismatch vs reference"

    print("KERNEL_OK")
</pallas_src>

<mosaic_0001>
module attributes {stable_mosaic.version = 11 : i64} {
  func.func @qnetwork_kernel(%arg0: i32, %arg1: memref<2x2000xbf16, #tpu.memory_space<vmem>>, %arg2: memref<2000x128xbf16, #tpu.memory_space<vmem>>, %arg3: memref<1x128xf32, #tpu.memory_space<vmem>>, %arg4: memref<128x128xbf16, #tpu.memory_space<vmem>>, %arg5: memref<1x128xf32, #tpu.memory_space<vmem>>, %arg6: memref<128x128xbf16, #tpu.memory_space<vmem>>, %arg7: memref<1x128xf32, #tpu.memory_space<vmem>>, %arg8: memref<2x128xf32, #tpu.memory_space<vmem>>) attributes {dimension_semantics = [#tpu.dimension_semantics<parallel>], iteration_bounds = array<i64: 1>, scalar_prefetch = 0 : i64, scratch_operands = 0 : i64, tpu.core_type = #tpu.core_type<tc>, window_params = [{transform_indices = @transform_0, window_bounds = array<i64: 2, 2000>}, {pipeline_mode = #tpu.pipeline_mode<synchronous>, transform_indices = @transform_1, window_bounds = array<i64: 2000, 128>}, {pipeline_mode = #tpu.pipeline_mode<synchronous>, transform_indices = @transform_2, window_bounds = array<i64: 1, 128>}, {pipeline_mode = #tpu.pipeline_mode<synchronous>, transform_indices = @transform_3, window_bounds = array<i64: 128, 128>}, {pipeline_mode = #tpu.pipeline_mode<synchronous>, transform_indices = @transform_4, window_bounds = array<i64: 1, 128>}, {pipeline_mode = #tpu.pipeline_mode<synchronous>, transform_indices = @transform_5, window_bounds = array<i64: 128, 128>}, {pipeline_mode = #tpu.pipeline_mode<synchronous>, transform_indices = @transform_6, window_bounds = array<i64: 1, 128>}, {transform_indices = @transform_7, window_bounds = array<i64: 2, 128>}]} {
    %c0 = arith.constant 0 : index
    %c0_0 = arith.constant 0 : index
    %0 = vector.load %arg1[%c0, %c0_0] : memref<2x2000xbf16, #tpu.memory_space<vmem>>, vector<2x2000xbf16>
    %c0_1 = arith.constant 0 : index
    %c0_2 = arith.constant 0 : index
    %1 = vector.load %arg2[%c0_1, %c0_2] : memref<2000x128xbf16, #tpu.memory_space<vmem>>, vector<2000x128xbf16>
    %cst = arith.constant dense<0.000000e+00> : vector<2x128xf32>
    %2 = tpu.matmul %0, %1, %cst {dimension_numbers = #tpu.dot_dimension_numbers<[1], [0], [0], [1], [0, 0, 1, 1], [], []>} : vector<2x2000xbf16>, vector<2000x128xbf16>, vector<2x128xf32> -> vector<2x128xf32>
    %c0_3 = arith.constant 0 : index
    %c0_4 = arith.constant 0 : index
    %3 = vector.load %arg3[%c0_3, %c0_4] : memref<1x128xf32, #tpu.memory_space<vmem>>, vector<1x128xf32>
    %4 = vector.broadcast %3 : vector<1x128xf32> to vector<2x128xf32>
    %5 = arith.addf %2, %4 : vector<2x128xf32>
    %cst_5 = arith.constant 0.000000e+00 : f32
    %6 = vector.broadcast %cst_5 : f32 to vector<2x128xf32>
    %7 = arith.maximumf %5, %6 : vector<2x128xf32>
    %8 = arith.truncf %7 : vector<2x128xf32> to vector<2x128xbf16>
    %c0_6 = arith.constant 0 : index
    %c0_7 = arith.constant 0 : index
    %9 = vector.load %arg4[%c0_6, %c0_7] : memref<128x128xbf16, #tpu.memory_space<vmem>>, vector<128x128xbf16>
    %cst_8 = arith.constant dense<0.000000e+00> : vector<2x128xf32>
    %10 = tpu.matmul %8, %9, %cst_8 {dimension_numbers = #tpu.dot_dimension_numbers<[1], [0], [0], [1], [0, 0, 1, 1], [], []>} : vector<2x128xbf16>, vector<128x128xbf16>, vector<2x128xf32> -> vector<2x128xf32>
    %c0_9 = arith.constant 0 : index
    %c0_10 = arith.constant 0 : index
    %11 = vector.load %arg5[%c0_9, %c0_10] : memref<1x128xf32, #tpu.memory_space<vmem>>, vector<1x128xf32>
    %12 = vector.broadcast %11 : vector<1x128xf32> to vector<2x128xf32>
    %13 = arith.addf %10, %12 : vector<2x128xf32>
    %cst_11 = arith.constant 0.000000e+00 : f32
    %14 = vector.broadcast %cst_11 : f32 to vector<2x128xf32>
    %15 = arith.maximumf %13, %14 : vector<2x128xf32>
    %16 = arith.truncf %15 : vector<2x128xf32> to vector<2x128xbf16>
    %c0_12 = arith.constant 0 : index
    %c0_13 = arith.constant 0 : index
    %17 = vector.load %arg6[%c0_12, %c0_13] : memref<128x128xbf16, #tpu.memory_space<vmem>>, vector<128x128xbf16>
    %cst_14 = arith.constant dense<0.000000e+00> : vector<2x128xf32>
    %18 = tpu.matmul %16, %17, %cst_14 {dimension_numbers = #tpu.dot_dimension_numbers<[1], [0], [0], [1], [0, 0, 1, 1], [], []>} : vector<2x128xbf16>, vector<128x128xbf16>, vector<2x128xf32> -> vector<2x128xf32>
    %c0_15 = arith.constant 0 : index
    %c0_16 = arith.constant 0 : index
    %19 = vector.load %arg7[%c0_15, %c0_16] : memref<1x128xf32, #tpu.memory_space<vmem>>, vector<1x128xf32>
    %20 = vector.broadcast %19 : vector<1x128xf32> to vector<2x128xf32>
    %21 = arith.addf %18, %20 : vector<2x128xf32>
    %c0_17 = arith.constant 0 : index
    %c0_18 = arith.constant 0 : index
    %22 = vector.load %arg8[%c0_17, %c0_18] : memref<2x128xf32, #tpu.memory_space<vmem>>, vector<2x128xf32>
    tpu.vector_store %arg8[%c0_17, %c0_18], %21 {strides = array<i32>} : memref<2x128xf32, #tpu.memory_space<vmem>>, vector<2x128xf32>,
    return
  }
  func.func @transform_0(%arg0: i32) -> (i32, i32) {
    %c0_i32 = arith.constant 0 : i32
    %c0_i32_0 = arith.constant 0 : i32
    return %arg0, %c0_i32 : i32, i32
  }
  func.func @transform_1(%arg0: i32) -> (i32, i32) {
    %c0_i32 = arith.constant 0 : i32
    %c0_i32_0 = arith.constant 0 : i32
    %c0_i32_1 = arith.constant 0 : i32
    return %c0_i32, %c0_i32_0 : i32, i32
  }
  func.func @transform_2(%arg0: i32) -> (i32, i32) {
    %c0_i32 = arith.constant 0 : i32
    %c0_i32_0 = arith.constant 0 : i32
    %c0_i32_1 = arith.constant 0 : i32
    return %c0_i32, %c0_i32_0 : i32, i32
  }
  func.func @transform_3(%arg0: i32) -> (i32, i32) {
    %c0_i32 = arith.constant 0 : i32
    %c0_i32_0 = arith.constant 0 : i32
    %c0_i32_1 = arith.constant 0 : i32
    return %c0_i32, %c0_i32_0 : i32, i32
  }
  func.func @transform_4(%arg0: i32) -> (i32, i32) {
    %c0_i32 = arith.constant 0 : i32
    %c0_i32_0 = arith.constant 0 : i32
    %c0_i32_1 = arith.constant 0 : i32
    return %c0_i32, %c0_i32_0 : i32, i32
  }
  func.func @transform_5(%arg0: i32) -> (i32, i32) {
    %c0_i32 = arith.constant 0 : i32
    %c0_i32_0 = arith.constant 0 : i32
    %c0_i32_1 = arith.constant 0 : i32
    return %c0_i32, %c0_i32_0 : i32, i32
  }
  func.func @transform_6(%arg0: i32) -> (i32, i32) {
    %c0_i32 = arith.constant 0 : i32
    %c0_i32_0 = arith.constant 0 : i32
    %c0_i32_1 = arith.constant 0 : i32
    return %c0_i32, %c0_i32_0 : i32, i32
  }
  func.func @transform_7(%arg0: i32) -> (i32, i32) {
    %c0_i32 = arith.constant 0 : i32
    %c0_i32_0 = arith.constant 0 : i32
    return %arg0, %c0_i32 : i32, i32
  }
}

</mosaic_0001>

<bundles_post_ra>
// kernel: qnetwork_forward.1
= control target key start
LH: loop header
LB: loop body
LE: loop exit
PB: predicated region body
PF: predicated region fallthrough
CT: control target
= control target key end

     0   :  { %12 = vsyncpa [#allocation3], 0  ;;  %s2445_s0 = inlined_call_operand.hbm [shape: bf16[2,2000], index: 0, kind: input, shape index: {}]   ;;  %s2446_s1 = inlined_call_operand.hbm [shape: bf16[2000,128], index: 1, kind: input, shape index: {}]   ;;  %s2447_s2 = inlined_call_operand.vmem [shape: f32[1,128], index: 2, kind: input, shape index: {}]   ;;  %s2448_s3 = inlined_call_operand.hbm [shape: bf16[128,128], index: 3, kind: input, shape index: {}]   ;;  %s2449_s4 = inlined_call_operand.vmem [shape: f32[1,128], index: 4, kind: input, shape index: {}]   ;;  %s2450_s5 = inlined_call_operand.hbm [shape: bf16[128,128], index: 5, kind: input, shape index: {}]   ;;  %s2451_s6 = inlined_call_operand.vmem [shape: f32[1,128], index: 6, kind: input, shape index: {}]   ;;  %s2452_s7 = inlined_call_operand.hbm [shape: f32[2,128], index: 7, kind: output, shape index: {}]  }
   0x1   :  { %13 = vsyncpa [#allocation6], 0 }
   0x2   :  { %14 = vsyncpa [#allocation9], 0  ;;  %s31_s26 = sshll.u32 %s2446_s1, 4  ;;  %s32_s26 = int_to_ptr.hbm [resolvable:$true] %s31_s26 }
   0x3   :  { %15 = vsyncpa [#allocation4], 0  ;;  %s2371_s27 = smov [#allocation5]   ;;  %s21_s8 = sshll.u32 %s2445_s0, 4  ;;  %s22_s8 = int_to_ptr.hbm [resolvable:$true] %s21_s8 }
   0x4   :  { %s33_s28 = sshll.u32 %s2371_s27, 4  ;;  %s2372_s9 = smov 64   ;;  %s34_s28 = int_to_ptr.vmem [resolvable:$true] %s33_s28 }
   0x5   :  { %s2373_s10 = smov 4   ;;  %s2374_s11 = smov [#allocation2]  }
   0x6   :  { %39 = dma.hbm_to_vmem [thread:$0]  %s32_s26, 16000, %s34_s28, [#allocation6], %s2372_s9, %s2372_s9, %s2373_s10  }
   0x7   :  { %s23_s12 = sshll.u32 %s2374_s11, 4  ;;  %s46_s15 = sshll.u32 %s2448_s3, 4  ;;  %s24_s12 = int_to_ptr.vmem [resolvable:$true] %s23_s12  ;;  %s47_s15 = int_to_ptr.hbm [resolvable:$true] %s46_s15 }
   0x8   :  { %26 = dma.hbm_to_vmem [thread:$0]  %s22_s8, 256, %s24_s12, [#allocation3]  }
   0x9   :  { %s61_s17 = sshll.u32 %s2450_s5, 4  ;;  %s2375_s18 = smov [#allocation7]   ;;  %s62_s17 = int_to_ptr.hbm [resolvable:$true] %s61_s17 }
   0xa   :  { %s48_s19 = sshll.u32 %s2375_s18, 4  ;;  %s2376_s0 = smov [#allocation8]   ;;  %s49_s19 = int_to_ptr.vmem [resolvable:$true] %s48_s19 }
   0xb   :  { %54 = dma.hbm_to_vmem [thread:$0]  %s47_s15, 1024, %s49_s19, [#allocation6], %s2372_s9, %s2372_s9, %s2373_s10  }
   0xc   :  { %s63_s20 = sshll.u32 %s2376_s0, 4  ;;  %s64_s20 = int_to_ptr.vmem [resolvable:$true] %s63_s20 }
   0xd   :  { %69 = dma.hbm_to_vmem [thread:$0]  %s62_s17, 1024, %s64_s20, [#allocation9], %s2372_s9, %s2372_s9, %s2373_s10  }
   0xe   :  { %2363 = dma.done.wait [#allocation3], 256  }
   0xf   :  { %2364 = vsyncadd [#allocation3], 4294967040 }
  0x10   :  { %2365 = dma.done.wait [#allocation6], 17024  }
  0x11   :  { %2366 = vsyncadd [#allocation6], 4294950272 }
  0x12   :  { %2367 = dma.done.wait [#allocation9], 1024  }
  0x13   :  { %2368 = vsyncadd [#allocation9], 4294966272  ;;  %v2099_v0 = vld [vmem:[#allocation5 + $0x38] sm:$0xff]  ;;  %v2098_v4 = vld [vmem:[#allocation5 + $0x30] sm:$0xff]  ;;  %vm1130_vm0 = vcmask 654336   ;;  %s2377_s24 = smov [#allocation10]  }
  0x14   :  { %v2107_v1 = vld [vmem:[#allocation5 + $0x78] sm:$0xff]  ;;  %1133 = vmatpush.bf16.msra.mxu0 %v2099_v0  ;;  %v2106_v5 = vld [vmem:[#allocation5 + $0x70] sm:$0xff]  ;;  %v2097_v8 = vld [vmem:[#allocation5 + $0x28] sm:$0xff]  ;;  %s1513_s25 = sshll.u32 %s2377_s24, 4  ;;  %s1515_s28 = sshll.u32 %s2452_s7, 4  ;;  %s1514_s25 = int_to_ptr.vmem [resolvable:$true] %s1513_s25  ;;  %s1516_s28 = int_to_ptr.hbm [resolvable:$true] %s1515_s28 }
  0x15   :  { %v2115_v2 = vld [vmem:[#allocation5 + $0xb8] sm:$0xff]  ;;  %1146 = vmatpush.bf16.msra.mxu1 %v2107_v1  ;;  %v2114_v6 = vld [vmem:[#allocation5 + $0xb0] sm:$0xff]  ;;  %v2105_v9 = vld [vmem:[#allocation5 + $0x68] sm:$0xff] }
  0x16   :  { %v2123_v3 = vld [vmem:[#allocation5 + $0xf8] sm:$0xff]  ;;  %1159 = vmatpush.bf16.msra.mxu2 %v2115_v2  ;;  %v2122_v7 = vld [vmem:[#allocation5 + $0xf0] sm:$0xff]  ;;  %v2113_v10 = vld [vmem:[#allocation5 + $0xa8] sm:$0xff] }
  0x17   :  { %1172 = vmatpush.bf16.msra.mxu3 %v2123_v3  ;;  %v2121_v11 = vld [vmem:[#allocation5 + $0xe8] sm:$0xff]  ;;  %v2096_v12 = vld [vmem:[#allocation5 + $0x20] sm:$0xff]  ;;  %v2095_v16 = vld [vmem:[#allocation5 + $0x18] sm:$0xff] }
  0x18   :  { %1134 = vmatpush.bf16.msra.mxu0 %v2098_v4  ;;  %v2104_v13 = vld [vmem:[#allocation5 + $0x60] sm:$0xff]  ;;  %v2103_v17 = vld [vmem:[#allocation5 + $0x58] sm:$0xff]  ;;  %v89_v20 = vld [vmem:[#allocation2] sm:$0xff] }
  0x19   :  { %1147 = vmatpush.bf16.msra.mxu1 %v2106_v5  ;;  %v2112_v14 = vld [vmem:[#allocation5 + $0xa0] sm:$0xff]  ;;  %v2111_v18 = vld [vmem:[#allocation5 + $0x98] sm:$0xff]  ;;  %v2094_v21 = vld [vmem:[#allocation5 + $0x10] sm:$0xff]  ;;  %346 = vst [vmem:[#allocation1] ss:$9 sm:$0xff] %v89_v20 }
  0x1a   :  { %1160 = vmatpush.bf16.msra.mxu2 %v2114_v6  ;;  %v2120_v15 = vld [vmem:[#allocation5 + $0xe0] sm:$0xff]  ;;  %v2119_v19 = vld [vmem:[#allocation5 + $0xd8] sm:$0xff]  ;;  %v2102_v22 = vld [vmem:[#allocation5 + $0x50] sm:$0xff] }
  0x1b   :  { %1173 = vmatpush.bf16.msra.mxu3 %v2122_v7  ;;  %v2110_v23 = vld [vmem:[#allocation5 + $0x90] sm:$0xff]  ;;  %v2093_v25 = vld [vmem:[#allocation5 + $0x8] sm:$0xff]  ;;  %v2092_v29 = vld [vmem:[#allocation5] sm:$0xff] }
  0x1c   :  { %1135 = vmatpush.bf16.msra.mxu0 %v2097_v8  ;;  %v2118_v24 = vld [vmem:[#allocation5 + $0xd0] sm:$0xff]  ;;  %v2101_v26 = vld [vmem:[#allocation5 + $0x48] sm:$0xff]  ;;  %v2100_v30 = vld [vmem:[#allocation5 + $0x40] sm:$0xff] }
  0x1d   :  { %1148 = vmatpush.bf16.msra.mxu1 %v2105_v9  ;;  %v2109_v27 = vld [vmem:[#allocation5 + $0x88] sm:$0xff]  ;;  %v2108_v31 = vld [vmem:[#allocation5 + $0x80] sm:$0xff]  ;;  %v2131_v32 = vld [vmem:[#allocation5 + $0x138] sm:$0xff] }
  0x1e   :  { %1161 = vmatpush.bf16.msra.mxu2 %v2113_v10  ;;  %v2117_v28 = vld [vmem:[#allocation5 + $0xc8] sm:$0xff]  ;;  %v2139_v33 = vld [vmem:[#allocation5 + $0x178] sm:$0xff]  ;;  %v2116_v35 = vld [vmem:[#allocation5 + $0xc0] sm:$0xff] }
  0x1f   :  { %1174 = vmatpush.bf16.msra.mxu3 %v2121_v11  ;;  %v2147_v34 = vld [vmem:[#allocation5 + $0x1b8] sm:$0xff]  ;;  %v2130_v38 = vld [vmem:[#allocation5 + $0x130] sm:$0xff]  ;;  %v2129_v45 = vld [vmem:[#allocation5 + $0x128] sm:$0xff] }
  0x20   :  { %1136 = vmatpush.bf16.msra.mxu0 %v2096_v12  ;;  %v2155_v36 = vld [vmem:[#allocation5 + $0x1f8] sm:$0xff]  ;;  %v347_v37 = vld [vmem:[#allocation1] sm:$0xff]  ;;  %v2138_v40 = vld [vmem:[#allocation5 + $0x170] sm:$0xff] }
  0x21   :  { %1149 = vmatpush.bf16.msra.mxu1 %v2104_v13  ;;  %v349_v39 = vld [vmem:[#allocation1 + $0x12] sm:$0xff]  ;;  %v2146_v41 = vld [vmem:[#allocation5 + $0x1b0] sm:$0xff]  ;;  %v350_v44 = vld [vmem:[#allocation1 + $0x1b] sm:$0xff] }
  0x22   :  { %1162 = vmatpush.bf16.msra.mxu2 %v2112_v14  ;;  %v348_v42 = vld [vmem:[#allocation1 + $0x9] sm:$0xff]  ;;  %v2137_v46 = vld [vmem:[#allocation5 + $0x168] sm:$0xff]  ;;  %v2128_v49 = vld [vmem:[#allocation5 + $0x120] sm:$0xff] }
  0x23   :  { %1175 = vmatpush.bf16.msra.mxu3 %v2120_v15  ;;  %v2154_v43 = vld [vmem:[#allocation5 + $0x1f0] sm:$0xff]  ;;  %v2145_v47 = vld [vmem:[#allocation5 + $0x1a8] sm:$0xff]  ;;  %v353_v50 = vld [vmem:[#allocation1 + $0x36] sm:$0xff] }
  0x24   :  { %1137 = vmatpush.bf16.msra.mxu0 %v2095_v16  ;;  %v2153_v48 = vld [vmem:[#allocation5 + $0x1e8] sm:$0xff]  ;;  %v90_v53 = vld [vmem:[#allocation2 + $0x8] sm:$0xff]  ;;  %v2136_v55 = vld [vmem:[#allocation5 + $0x160] sm:$0xff] }
  0x25   :  { %1150 = vmatpush.bf16.msra.mxu1 %v2103_v17  ;;  %v351_v51 = vld [vmem:[#allocation1 + $0x24] sm:$0xff]  ;;  %v352_v54 = vld [vmem:[#allocation1 + $0x2d] sm:$0xff]  ;;  %v2144_v56 = vld [vmem:[#allocation5 + $0x1a0] sm:$0xff] }
  0x26   :  { %1163 = vmatpush.bf16.msra.mxu2 %v2111_v18  ;;  %v2430_v52 = vld [vmem:[#allocation1 + $0x3f] sm:$0xff]  ;;  %v2127_v58 = vld [vmem:[#allocation5 + $0x118] sm:$0xff]  ;;  %v2126_v62 = vld [vmem:[#allocation5 + $0x110] sm:$0xff] }
  0x27   :  { %1176 = vmatpush.bf16.msra.mxu3 %v2119_v19  ;;  %356 = vst [vmem:[#allocation1] ss:$9 sm:$0xff] %v90_v53  ;;  %v2152_v57 = vld [vmem:[#allocation5 + $0x1e0] sm:$0xff]  ;;  %v2135_v59 = vld [vmem:[#allocation5 + $0x158] sm:$0xff]  ;;  %v2134_v63 = vld [vmem:[#allocation5 + $0x150] sm:$0xff] }
  0x28   :  { %1138 = vmatpush.bf16.msra.mxu0 %v2094_v21  ;;  %v2143_v60 = vld [vmem:[#allocation5 + $0x198] sm:$0xff]  ;;  %v2142_v0 = vld [vmem:[#allocation5 + $0x190] sm:$0xff]  ;;  %v2125_v2 = vld [vmem:[#allocation5 + $0x108] sm:$0xff] }
  0x29   :  { %1151 = vmatpush.bf16.msra.mxu1 %v2102_v22  ;;  %v2151_v61 = vld [vmem:[#allocation5 + $0x1d8] sm:$0xff]  ;;  %v2150_v1 = vld [vmem:[#allocation5 + $0x1d0] sm:$0xff]  ;;  %v2133_v3 = vld [vmem:[#allocation5 + $0x148] sm:$0xff] }
  0x2a   :  { %1164 = vmatpush.bf16.msra.mxu2 %v2110_v23  ;;  %v2141_v4 = vld [vmem:[#allocation5 + $0x188] sm:$0xff]  ;;  %v2124_v6 = vld [vmem:[#allocation5 + $0x100] sm:$0xff]  ;;  %v2163_v9 = vld [vmem:[#allocation5 + $0x238] sm:$0xff] }
  0x2b   :  { %1177 = vmatpush.bf16.msra.mxu3 %v2118_v24  ;;  %v2149_v5 = vld [vmem:[#allocation5 + $0x1c8] sm:$0xff]  ;;  %v2132_v7 = vld [vmem:[#allocation5 + $0x140] sm:$0xff]  ;;  %v2171_v10 = vld [vmem:[#allocation5 + $0x278] sm:$0xff] }
  0x2c   :  { %1139 = vmatpush.bf16.msra.mxu0 %v2093_v25  ;;  %v2140_v8 = vld [vmem:[#allocation5 + $0x180] sm:$0xff]  ;;  %v2179_v11 = vld [vmem:[#allocation5 + $0x2b8] sm:$0xff]  ;;  %v2162_v14 = vld [vmem:[#allocation5 + $0x230] sm:$0xff] }
  0x2d   :  { %1152 = vmatpush.bf16.msra.mxu1 %v2101_v26  ;;  %v2148_v12 = vld [vmem:[#allocation5 + $0x1c0] sm:$0xff]  ;;  %v2187_v13 = vld [vmem:[#allocation5 + $0x2f8] sm:$0xff]  ;;  %v2170_v15 = vld [vmem:[#allocation5 + $0x270] sm:$0xff] }
  0x2e   :  { %1165 = vmatpush.bf16.msra.mxu2 %v2109_v27  ;;  %v2178_v16 = vld [vmem:[#allocation5 + $0x2b0] sm:$0xff]  ;;  %v2161_v18 = vld [vmem:[#allocation5 + $0x228] sm:$0xff]  ;;  %v2160_v22 = vld [vmem:[#allocation5 + $0x220] sm:$0xff] }
  0x2f   :  { %1178 = vmatpush.bf16.msra.mxu3 %v2117_v28  ;;  %v2186_v17 = vld [vmem:[#allocation5 + $0x2f0] sm:$0xff]  ;;  %v2169_v19 = vld [vmem:[#allocation5 + $0x268] sm:$0xff]  ;;  %v2168_v23 = vld [vmem:[#allocation5 + $0x260] sm:$0xff] }
  0x30   :  { %1140 = vmatpush.bf16.msra.mxu0 %v2092_v29  ;;  %v2177_v20 = vld [vmem:[#allocation5 + $0x2a8] sm:$0xff]  ;;  %v2176_v24 = vld [vmem:[#allocation5 + $0x2a0] sm:$0xff]  ;;  %v2159_v26 = vld [vmem:[#allocation5 + $0x218] sm:$0xff] }
  0x31   :  { %1153 = vmatpush.bf16.msra.mxu1 %v2100_v30  ;;  %v2185_v21 = vld [vmem:[#allocation5 + $0x2e8] sm:$0xff]  ;;  %v2184_v25 = vld [vmem:[#allocation5 + $0x2e0] sm:$0xff]  ;;  %v2167_v27 = vld [vmem:[#allocation5 + $0x258] sm:$0xff] }
  0x32   :  { %1166 = vmatpush.bf16.msra.mxu2 %v2108_v31  ;;  %v2175_v28 = vld [vmem:[#allocation5 + $0x298] sm:$0xff]  ;;  %v2158_v30 = vld [vmem:[#allocation5 + $0x210] sm:$0xff]  ;;  %v2193_v53 = vld [vmem:[#allocation5 + $0x328] sm:$0xff] }
  0x33   :  { %1179 = vmatpush.bf16.msra.mxu3 %v2116_v35  ;;  %1141 = vmatmul.bf16.vlgmr.msra.gmra.mxu0 %v347_v37  ;;  %v2183_v29 = vld [vmem:[#allocation5 + $0x2d8] sm:$0xff]  ;;  %v2166_v31 = vld [vmem:[#allocation5 + $0x250] sm:$0xff]  ;;  %v2165_v35 = vld [vmem:[#allocation5 + $0x248] sm:$0xff] }
  0x34   :  { %1185 = vmatpush.bf16.msrb.mxu0 %v2131_v32  ;;  %1154 = vmatmul.bf16.vlgmr.msra.gmra.mxu1 %v348_v42  ;;  %v2174_v32 = vld [vmem:[#allocation5 + $0x290] sm:$0xff]  ;;  %v2181_v37 = vld [vmem:[#allocation5 + $0x2c8] sm:$0xff]  ;;  %v2203_v42 = vld [vmem:[#allocation5 + $0x378] sm:$0xff] }
  0x35   :  { %1198 = vmatpush.bf16.msrb.mxu1 %v2139_v33  ;;  %1167 = vmatmul.bf16.vlgmr.msra.gmra.mxu2 %v349_v39  ;;  %v2182_v33 = vld [vmem:[#allocation5 + $0x2d0] sm:$0xff]  ;;  %v2164_v39 = vld [vmem:[#allocation5 + $0x240] sm:$0xff] }
  0x36   :  { %1211 = vmatpush.bf16.msrb.mxu2 %v2147_v34  ;;  %1180 = vmatmul.bf16.vlgmr.msra.gmra.mxu3 %v350_v44  ;;  %v2157_v34 = vld [vmem:[#allocation5 + $0x208] sm:$0xff]  ;;  %v2180_v44 = vld [vmem:[#allocation5 + $0x2c0] sm:$0xff] }
  0x37   :  { %1224 = vmatpush.bf16.msrb.mxu3 %v2155_v36  ;;  %v2173_v36 = vld [vmem:[#allocation5 + $0x288] sm:$0xff] }
  0x38   :  { %1186 = vmatpush.bf16.msrb.mxu0 %v2130_v38  ;;  %v2156_v38 = vld [vmem:[#allocation5 + $0x200] sm:$0xff] }
  0x39   :  { %1199 = vmatpush.bf16.msrb.mxu1 %v2138_v40  ;;  %v2172_v40 = vld [vmem:[#allocation5 + $0x280] sm:$0xff] }
  0x3a   :  { %1212 = vmatpush.bf16.msrb.mxu2 %v2146_v41  ;;  %v2195_v41 = vld [vmem:[#allocation5 + $0x338] sm:$0xff] }
  0x3b   :  { %1225 = vmatpush.bf16.msrb.mxu3 %v2154_v43  ;;  %v2211_v43 = vld [vmem:[#allocation5 + $0x3b8] sm:$0xff] }
  0x3c   :  { %1187 = vmatpush.bf16.msrb.mxu0 %v2129_v45  ;;  %v357_v45 = vld [vmem:[#allocation1] sm:$0xff] }
  0x3d   :  { %1200 = vmatpush.bf16.msrb.mxu1 %v2137_v46  ;;  %v359_v46 = vld [vmem:[#allocation1 + $0x12] sm:$0xff] }
  0x3e   :  { %1213 = vmatpush.bf16.msrb.mxu2 %v2145_v47  ;;  %v358_v47 = vld [vmem:[#allocation1 + $0x9] sm:$0xff] }
  0x3f   :  { %1226 = vmatpush.bf16.msrb.mxu3 %v2153_v48  ;;  %v2194_v48 = vld [vmem:[#allocation5 + $0x330] sm:$0xff] }
  0x40   :  { %1188 = vmatpush.bf16.msrb.mxu0 %v2128_v49  ;;  %v2216_v49 = vld [vmem:[#allocation5 + $0x3e0] sm:$0xff] }
  0x41   :  { %1201 = vmatpush.bf16.msrb.mxu1 %v2136_v55  ;;  %v2201_v55 = vld [vmem:[#allocation5 + $0x368] sm:$0xff] }
  0x42   :  { %1214 = vmatpush.bf16.msrb.mxu2 %v2144_v56  ;;  %v2209_v56 = vld [vmem:[#allocation5 + $0x3a8] sm:$0xff] }
  0x43   :  { %1227 = vmatpush.bf16.msrb.mxu3 %v2152_v57  ;;  %v2192_v57 = vld [vmem:[#allocation5 + $0x320] sm:$0xff] }
  0x44   :  { %1189 = vmatpush.bf16.msrb.mxu0 %v2127_v58  ;;  %v2214_v58 = vld [vmem:[#allocation5 + $0x3d0] sm:$0xff] }
  0x45   :  { %1202 = vmatpush.bf16.msrb.mxu1 %v2135_v59  ;;  %v2200_v59 = vld [vmem:[#allocation5 + $0x360] sm:$0xff] }
  0x46   :  { %1215 = vmatpush.bf16.msrb.mxu2 %v2143_v60  ;;  %v2208_v60 = vld [vmem:[#allocation5 + $0x3a0] sm:$0xff] }
  0x47   :  { %1228 = vmatpush.bf16.msrb.mxu3 %v2151_v61  ;;  %v2191_v61 = vld [vmem:[#allocation5 + $0x318] sm:$0xff] }
  0x48   :  { %1190 = vmatpush.bf16.msrb.mxu0 %v2126_v62  ;;  %v2213_v62 = vld [vmem:[#allocation5 + $0x3c8] sm:$0xff] }
  0x49   :  { %1203 = vmatpush.bf16.msrb.mxu1 %v2134_v63  ;;  %v2199_v63 = vld [vmem:[#allocation5 + $0x358] sm:$0xff] }
  0x4a   :  { %1216 = vmatpush.bf16.msrb.mxu2 %v2142_v0  ;;  %v2207_v0 = vld [vmem:[#allocation5 + $0x398] sm:$0xff] }
  0x4b   :  { %1229 = vmatpush.bf16.msrb.mxu3 %v2150_v1  ;;  %v2190_v1 = vld [vmem:[#allocation5 + $0x310] sm:$0xff] }
  0x4c   :  { %1191 = vmatpush.bf16.msrb.mxu0 %v2125_v2  ;;  %v2212_v2 = vld [vmem:[#allocation5 + $0x3c0] sm:$0xff] }
  0x4d   :  { %1204 = vmatpush.bf16.msrb.mxu1 %v2133_v3  ;;  %v2198_v3 = vld [vmem:[#allocation5 + $0x350] sm:$0xff] }
  0x4e   :  { %1217 = vmatpush.bf16.msrb.mxu2 %v2141_v4  ;;  %v2206_v4 = vld [vmem:[#allocation5 + $0x390] sm:$0xff] }
  0x4f   :  { %1230 = vmatpush.bf16.msrb.mxu3 %v2149_v5  ;;  %v2189_v5 = vld [vmem:[#allocation5 + $0x308] sm:$0xff] }
  0x50   :  { %1192 = vmatpush.bf16.msrb.mxu0 %v2124_v6  ;;  %v364_v6 = vld [vmem:[#allocation1 + $0x3f] sm:$0xff] }
  0x51   :  { %1205 = vmatpush.bf16.msrb.mxu1 %v2132_v7  ;;  %v2197_v7 = vld [vmem:[#allocation5 + $0x348] sm:$0xff] }
  0x52   :  { %1218 = vmatpush.bf16.msrb.mxu2 %v2140_v8  ;;  %v2205_v8 = vld [vmem:[#allocation5 + $0x388] sm:$0xff] }
  0x53   :  { %1231 = vmatpush.bf16.msrb.mxu3 %v2148_v12  ;;  %1193 = vmatmul.bf16.vlgmr.msrb.gmra.mxu0 %v351_v51  ;;  %v360_v51 = vld [vmem:[#allocation1 + $0x1b] sm:$0xff]  ;;  %v361_v12 = vld [vmem:[#allocation1 + $0x24] sm:$0xff] }
  0x54   :  { %1237 = vmatpush.bf16.msra.mxu0 %v2163_v9  ;;  %1206 = vmatmul.bf16.vlgmr.msrb.gmra.mxu1 %v352_v54  ;;  %v2215_v54 = vld [vmem:[#allocation5 + $0x3d8] sm:$0xff]  ;;  %v2188_v9 = vld [vmem:[#allocation5 + $0x300] sm:$0xff] }
  0x55   :  { %1250 = vmatpush.bf16.msra.mxu1 %v2171_v10  ;;  %1219 = vmatmul.bf16.vlgmr.msrb.gmra.mxu2 %v353_v50  ;;  %v2202_v50 = vld [vmem:[#allocation5 + $0x370] sm:$0xff]  ;;  %v2196_v10 = vld [vmem:[#allocation5 + $0x340] sm:$0xff] }
  0x56   :  { %1263 = vmatpush.bf16.msra.mxu2 %v2179_v11  ;;  %1232 = vmatmul.bf16.vlgmr.msrb.gmra.mxu3 %v2430_v52  ;;  %v2210_v52 = vld [vmem:[#allocation5 + $0x3b0] sm:$0xff]  ;;  %v2204_v11 = vld [vmem:[#allocation5 + $0x380] sm:$0xff] }
  0x57   :  { %1276 = vmatpush.bf16.msra.mxu3 %v2187_v13  ;;  %v362_v13 = vld [vmem:[#allocation1 + $0x2d] sm:$0xff] }
  0x58   :  { %1238 = vmatpush.bf16.msra.mxu0 %v2162_v14  ;;  %v363_v14 = vld [vmem:[#allocation1 + $0x36] sm:$0xff] }
  0x59   :  { %1251 = vmatpush.bf16.msra.mxu1 %v2170_v15  ;;  %v2240_v15 = vld [vmem:[%s2447_s2] ss:$0 sm:$0xff] }
  0x5a   :  { %1264 = vmatpush.bf16.msra.mxu2 %v2178_v16 }
  0x5b   :  { %1277 = vmatpush.bf16.msra.mxu3 %v2186_v17 }
  0x5c   :  { %1239 = vmatpush.bf16.msra.mxu0 %v2161_v18 }
  0x5d   :  { %1252 = vmatpush.bf16.msra.mxu1 %v2169_v19 }
  0x5e   :  { %1265 = vmatpush.bf16.msra.mxu2 %v2177_v20 }
  0x5f   :  { %1278 = vmatpush.bf16.msra.mxu3 %v2185_v21 }
  0x60   :  { %1240 = vmatpush.bf16.msra.mxu0 %v2160_v22 }
  0x61   :  { %1253 = vmatpush.bf16.msra.mxu1 %v2168_v23 }
  0x62   :  { %1266 = vmatpush.bf16.msra.mxu2 %v2176_v24 }
  0x63   :  { %1279 = vmatpush.bf16.msra.mxu3 %v2184_v25 }
  0x64   :  { %1241 = vmatpush.bf16.msra.mxu0 %v2159_v26 }
  0x65   :  { %1254 = vmatpush.bf16.msra.mxu1 %v2167_v27 }
  0x66   :  { %1267 = vmatpush.bf16.msra.mxu2 %v2175_v28 }
  0x67   :  { %1280 = vmatpush.bf16.msra.mxu3 %v2183_v29 }
  0x68   :  { %1242 = vmatpush.bf16.msra.mxu0 %v2158_v30 }
  0x69   :  { %1255 = vmatpush.bf16.msra.mxu1 %v2166_v31  ;;  %v2224_v31 = vld [vmem:[#allocation7 + $0x38] sm:$0xff] }
  0x6a   :  { %1268 = vmatpush.bf16.msra.mxu2 %v2174_v32 }
  0x6b   :  { %1281 = vmatpush.bf16.msra.mxu3 %v2182_v33 }
  0x6c   :  { %1243 = vmatpush.bf16.msra.mxu0 %v2157_v34  ;;  %v2223_v34 = vld [vmem:[#allocation7 + $0x30] sm:$0xff] }
  0x6d   :  { %1256 = vmatpush.bf16.msra.mxu1 %v2165_v35 }
  0x6e   :  { %1269 = vmatpush.bf16.msra.mxu2 %v2173_v36 }
  0x6f   :  { %1282 = vmatpush.bf16.msra.mxu3 %v2181_v37  ;;  %v2222_v37 = vld [vmem:[#allocation7 + $0x28] sm:$0xff] }
  0x70   :  { %1244 = vmatpush.bf16.msra.mxu0 %v2156_v38 }
  0x71   :  { %1257 = vmatpush.bf16.msra.mxu1 %v2164_v39  ;;  %v2221_v39 = vld [vmem:[#allocation7 + $0x20] sm:$0xff] }
  0x72   :  { %1270 = vmatpush.bf16.msra.mxu2 %v2172_v40  ;;  %v2220_v40 = vld [vmem:[#allocation7 + $0x18] sm:$0xff] }
  0x73   :  { %1283 = vmatpush.bf16.msra.mxu3 %v2180_v44  ;;  %1245 = vmatmul.bf16.vlgmr.msra.gmra.mxu0 %v357_v45  ;;  %v2218_v44 = vld [vmem:[#allocation7 + $0x8] sm:$0xff] }
  0x74   :  { %1289 = vmatpush.bf16.msrb.mxu0 %v2195_v41  ;;  %1258 = vmatmul.bf16.vlgmr.msra.gmra.mxu1 %v358_v47 }
  0x75   :  { %1302 = vmatpush.bf16.msrb.mxu1 %v2203_v42  ;;  %1271 = vmatmul.bf16.vlgmr.msra.gmra.mxu2 %v359_v46  ;;  %v2219_v42 = vld [vmem:[#allocation7 + $0x10] sm:$0xff] }
  0x76   :  { %1315 = vmatpush.bf16.msrb.mxu2 %v2211_v43  ;;  %1284 = vmatmul.bf16.vlgmr.msra.gmra.mxu3 %v360_v51 }
  0x77   :  { %1331 = vmatpush.bf16.msrb.mxu3 %v2216_v49 }
  0x78   :  { %1290 = vmatpush.bf16.msrb.mxu0 %v2194_v48 }
  0x79   :  { %1303 = vmatpush.bf16.msrb.mxu1 %v2202_v50  ;;  %v2217_v50 = vld [vmem:[#allocation7] sm:$0xff] }
  0x7a   :  { %1316 = vmatpush.bf16.msrb.mxu2 %v2210_v52 }
  0x7b   :  { %1332 = vmatpush.bf16.msrb.mxu3 %v2215_v54 }
  0x7c   :  { %1291 = vmatpush.bf16.msrb.mxu0 %v2193_v53  ;;  %v2232_v53 = vld [vmem:[#allocation8 + $0x38] sm:$0xff] }
  0x7d   :  { %1304 = vmatpush.bf16.msrb.mxu1 %v2201_v55  ;;  %v2231_v55 = vld [vmem:[#allocation8 + $0x30] sm:$0xff] }
  0x7e   :  { %1317 = vmatpush.bf16.msrb.mxu2 %v2209_v56 }
  0x7f   :  { %1333 = vmatpush.bf16.msrb.mxu3 %v2214_v58 }
  0x80   :  { %1292 = vmatpush.bf16.msrb.mxu0 %v2192_v57 }
  0x81   :  { %1305 = vmatpush.bf16.msrb.mxu1 %v2200_v59  ;;  %v2230_v59 = vld [vmem:[#allocation8 + $0x28] sm:$0xff] }
  0x82   :  { %1318 = vmatpush.bf16.msrb.mxu2 %v2208_v60 }
  0x83   :  { %1334 = vmatpush.bf16.msrb.mxu3 %v2213_v62 }
  0x84   :  { %1293 = vmatpush.bf16.msrb.mxu0 %v2191_v61  ;;  %v2229_v61 = vld [vmem:[#allocation8 + $0x20] sm:$0xff] }
  0x85   :  { %1306 = vmatpush.bf16.msrb.mxu1 %v2199_v63 }
  0x86   :  { %1319 = vmatpush.bf16.msrb.mxu2 %v2207_v0  ;;  %v2228_v0 = vld [vmem:[#allocation8 + $0x18] sm:$0xff] }
  0x87   :  { %1335 = vmatpush.bf16.msrb.mxu3 %v2212_v2 }
  0x88   :  { %1294 = vmatpush.bf16.msrb.mxu0 %v2190_v1 }
  0x89   :  { %1307 = vmatpush.bf16.msrb.mxu1 %v2198_v3 }
  0x8a   :  { %1320 = vmatpush.bf16.msrb.mxu2 %v2206_v4  ;;  %2027 = vmatmul.msk.bf16.vlgmr.msrb.gmra.mxu3 %vm1130_vm0, %v364_v6 }
  0x8b   :  { %1411 = vmatpush.bf16.msra.mxu3 %v2224_v31 }
  0x8c   :  { %1295 = vmatpush.bf16.msrb.mxu0 %v2189_v5  ;;  %v2227_v5 = vld [vmem:[#allocation8 + $0x10] sm:$0xff] }
  0x8d   :  { %1308 = vmatpush.bf16.msrb.mxu1 %v2197_v7 }
  0x8e   :  { %1321 = vmatpush.bf16.msrb.mxu2 %v2205_v8 }
  0x8f   :  { %1412 = vmatpush.bf16.msra.mxu3 %v2223_v34 }
  0x90   :  { %1296 = vmatpush.bf16.msrb.mxu0 %v2188_v9 }
  0x91   :  { %1309 = vmatpush.bf16.msrb.mxu1 %v2196_v10 }
  0x92   :  { %1322 = vmatpush.bf16.msrb.mxu2 %v2204_v11 }
  0x93   :  { %1297 = vmatmul.bf16.vlgmr.msrb.gmra.mxu0 %v361_v12  ;;  %1413 = vmatpush.bf16.msra.mxu3 %v2222_v37 }
  0x94   :  { %1310 = vmatmul.bf16.vlgmr.msrb.gmra.mxu1 %v362_v13  ;;  %1494 = vmatpush.bf16.msra.mxu0 %v2232_v53 }
  0x95   :  { %1323 = vmatmul.bf16.vlgmr.msrb.gmra.mxu2 %v363_v14 }
  0x97   :  { %1414 = vmatpush.bf16.msra.mxu3 %v2221_v39 }
  0x98   :  { %1495 = vmatpush.bf16.msra.mxu0 %v2231_v55 }
  0x9b   :  { %1415 = vmatpush.bf16.msra.mxu3 %v2220_v40 }
  0x9c   :  { %1496 = vmatpush.bf16.msra.mxu0 %v2230_v59 }
  0x9f   :  { %1416 = vmatpush.bf16.msra.mxu3 %v2219_v42 }
  0xa0   :  { %1497 = vmatpush.bf16.msra.mxu0 %v2229_v61 }
  0xa3   :  { %1417 = vmatpush.bf16.msra.mxu3 %v2218_v44 }
  0xa4   :  { %1498 = vmatpush.bf16.msra.mxu0 %v2228_v0 }
  0xa7   :  { %1418 = vmatpush.bf16.msra.mxu3 %v2217_v50 }
  0xa8   :  { %1499 = vmatpush.bf16.msra.mxu0 %v2227_v5 }
  0xb0   :  { %v1142_v16 = vpop.f32.mrf.mxu0 }
  0xb1   :  { %v1143_v17 = vadd.f32 %v2240_v15, %v1142_v16  ;;  %v1155_v18 = vpop.f32.mrf.mxu1  ;;  %v2226_v16 = vld [vmem:[#allocation8 + $0x8] sm:$0xff] }
  0xb2   :  { %1500 = vmatpush.bf16.msra.mxu0 %v2226_v16 }
  0xb3   :  { %v1156_v19 = vadd.f32 %v1155_v18, %v1143_v17  ;;  %v2225_v17 = vld [vmem:[#allocation8] sm:$0xff] }
  0xb4   :  { %v2241_v18 = vld [vmem:[%s2449_s4] ss:$0 sm:$0xff] }
  0xb6   :  { %1501 = vmatpush.bf16.msra.mxu0 %v2225_v17 }
  0xb8   :  { %v1168_v20 = vpop.f32.mrf.mxu2  ;;  %v1144_v22 = vpop.f32.mrf.mxu0 }
  0xb9   :  { %v1169_v21 = vadd.f32 %v1168_v20, %v1156_v19  ;;  %v1181_v23 = vpop.f32.mrf.mxu3  ;;  %v1157_v24 = vpop.f32.mrf.mxu1 }
  0xba   :  { %v2242_v24 = vld [vmem:[%s2451_s6] ss:$0 sm:$0xff] }
  0xbb   :  { %v1182_v25 = vadd.f32 %v1181_v23, %v1169_v21 }
  0xc0   :  { %v1170_v26 = vpop.f32.mrf.mxu2 }
  0xc1   :  { %v1183_v27 = vpop.f32.mrf.mxu3 }
  0xd0   :  { %v1194_v28 = vpop.f32.mrf.mxu0 }
  0xd1   :  { %v1207_v29 = vpop.f32.mrf.mxu1  ;;  %v1195_v45 = vadd.f32 %v1194_v28, %v1182_v25 }
  0xd3   :  { %v1208_v51 = vadd.f32 %v1207_v29, %v1195_v45 }
  0xd8   :  { %v1220_v30 = vpop.f32.mrf.mxu2  ;;  %v1196_v33 = vpop.f32.mrf.mxu0 }
  0xd9   :  { %v1233_v32 = vpop.f32.mrf.mxu3  ;;  %v1209_v35 = vpop.f32.mrf.mxu1  ;;  %v1221_v52 = vadd.f32 %v1220_v30, %v1208_v51 }
  0xdb   :  { %v1234_v57 = vadd.f32 %v1233_v32, %v1221_v52 }
  0xe0   :  { %v1222_v36 = vpop.f32.mrf.mxu2 }
  0xe1   :  { %v1235_v38 = vpop.f32.mrf.mxu3 }
  0xf0   :  { %v1246_v41 = vpop.f32.mrf.mxu0 }
  0xf1   :  { %v1259_v43 = vpop.f32.mrf.mxu1  ;;  %v1247_v58 = vadd.f32 %v1246_v41, %v1234_v57 }
  0xf3   :  { %v1260_v60 = vadd.f32 %v1259_v43, %v1247_v58 }
  0xf8   :  { %v1272_v46 = vpop.f32.mrf.mxu2  ;;  %v1248_v47 = vpop.f32.mrf.mxu0 }
  0xf9   :  { %v1285_v48 = vpop.f32.mrf.mxu3  ;;  %v1261_v49 = vpop.f32.mrf.mxu1  ;;  %v1273_v62 = vadd.f32 %v1272_v46, %v1260_v60 }
  0xfb   :  { %v1286_v2 = vadd.f32 %v1285_v48, %v1273_v62 }
 0x100   :  { %v1274_v54 = vpop.f32.mrf.mxu2 }
 0x101   :  { %v1287_v56 = vpop.f32.mrf.mxu3 }
 0x10d   :  { %v1337_v63 = vpop.f32.mrf.mxu3 }
 0x110   :  { %v1298_v1 = vpop.f32.mrf.mxu0 }
 0x111   :  { %v1311_v3 = vpop.f32.mrf.mxu1  ;;  %v1299_v4 = vadd.f32 %v1298_v1, %v1286_v2 }
 0x113   :  { %v1312_v7 = vadd.f32 %v1311_v3, %v1299_v4 }
 0x115   :  { %v1339_v6 = vpop.f32.mrf.mxu3 }
 0x118   :  { %v1324_v8 = vpop.f32.mrf.mxu2  ;;  %v1300_v9 = vpop.f32.mrf.mxu0 }
 0x119   :  { %v1325_v10 = vadd.f32 %v1324_v8, %v1312_v7  ;;  %v1313_v11 = vpop.f32.mrf.mxu1 }
 0x11b   :  { %v1338_v12 = vadd.f32 %v1337_v63, %v1325_v10 }
 0x11d   :  { %v1341_v13 = vmax.f32 %v1338_v12, 0.0 }
 0x11f   :  { %v1342_v14 = vpack.c.bf16 %v1341_v13, %v1341_v13 }
 0x120   :  { %v1326_v15 = vpop.f32.mrf.mxu2 }
 0x121   :  { %1419 = vmatmul.bf16.vlgmr.msra.gmra.mxu3 %v1342_v14 }
 0x1a4   :  { %v1420_v19 = vpop.f32.mrf.mxu3 }
 0x1a5   :  { %v1421_v20 = vadd.f32 %v2241_v18, %v1420_v19 }
 0x1a7   :  { %v1424_v21 = vmax.f32 %v1421_v20, 0.0 }
 0x1a9   :  { %v1425_v22 = vpack.c.bf16 %v1424_v21, %v1424_v21 }
 0x1ab   :  { %1502 = vmatmul.bf16.vlgmr.msra.gmra.mxu0 %v1425_v22 }
 0x1ac   :  { %v1422_v23 = vpop.f32.mrf.mxu3 }
 0x228   :  { %v1503_v25 = vpop.f32.mrf.mxu0 }
 0x229   :  { %v1504_v26 = vadd.f32 %v2242_v24, %v1503_v25 }
 0x22b   :  { %1507 = vst [vmem:[#allocation10] sm:$0x3] %v1504_v26 }
 0x22c   :  { %1518 = dma.vmem_to_hbm [thread:$0]  %s1514_s25, 32, %s1516_s28, [#allocation4]  }
 0x230   :  { %v1505_v27 = vpop.f32.mrf.mxu0 }
 0x231   :  { %2369 = dma.done.wait [#allocation4], 32  }
 0x232   :  { %2370 = vsyncadd [#allocation4], 4294967264 }
 0x233   :  { %1523 = vsyncpa [#allocation3], 1 }
 0x234   :  { %1524 = vsyncpa [#allocation6], 1 }
 0x235   :  { %1525 = vsyncpa [#allocation9], 1 }
 0x236   :  { %1526 = vsyncpa [#allocation4], 1 }

</bundles_post_ra>
